<compile_context>
chip_gen: v7x
topology: tpu7x:2x2x1
jax: 0.10.0
libtpu: 0.0.40
codegen_flags: <defaults>
</compile_context>

<pallas_src>
import functools

import jax
import jax.numpy as jnp
import numpy as np
from jax.experimental import pallas as pl
from jax.experimental.pallas import tpu as pltpu


def moe_grn_kernel(x_ref, noise_ref, wf_ref, wstk_ref, side_ref, out_ref,
                   *, num_experts, gate_lane, out_dim, fc1_real, eps):
    E = num_experts
    x = x_ref[...]                                        # (B, input_dim) bf16
    B = x.shape[0]

    side = side_ref[...]                                  # (8, 256) f32 packed side params
    bf = side[0:1, :]                                     # fused (fc1|gate) bias
    b2 = side[1:2, :128]                                  # fc2 bias (compact layout)
    bc = side[2:3, :128]                                  # classifier bias
    gamma = side[3:4, :128]                               # GRN gamma (at gate lanes)
    beta = side[4:5, :128]                                # GRN beta  (at gate lanes)

    # ---- fused (fc1 | gate) matmul: bf16 operands, f32 accumulation on the MXU ----
    z = jnp.dot(x, wf_ref[...], preferred_element_type=jnp.float32) + bf   # (B, 256)

    # ---- gate path: gate occupies lanes [gate_lane, gate_lane+E) of the 2nd 128 slab
    slab = z[:, 128:256]                                  # (B, 128)
    lane = jax.lax.broadcasted_iota(jnp.int32, (B, 128), 1)
    gate_mask = (lane >= gate_lane) & (lane < gate_lane + E)

    # mask BEFORE the GRN sum so fc1 activations sharing this slab don't pollute it.
    gl = jnp.where(gate_mask, slab + noise_ref[...], 0.0)

    # GRN over the expert dim (per-row L2 norm, normalized by the batch-mean norm).
    Gx = jnp.sqrt(jnp.sum(gl * gl, axis=1, keepdims=True))               # (B, 1)
    Nx = Gx * pl.reciprocal(jnp.mean(Gx, axis=0, keepdims=True) + eps, approx=True)
    gl = gamma * (gl * Nx) + beta                          # non-gate lanes stay exactly 0

    # masked softmax + top-2 (softmax is monotone -> top-2 of logits == top-2 of probs,
    # so the softmax max doubles as the top-1 value: one fewer cross-lane reduction).
    neg = jnp.float32(-1e30)
    glm = jnp.where(gate_mask, gl, neg)
    m = jnp.max(glm, axis=-1, keepdims=True)                              # top-1 value
    i1 = jnp.min(jnp.where(glm == m, lane, 128), axis=-1, keepdims=True)  # first occ.
    mask1 = lane == i1
    gl2 = jnp.where(mask1, neg, glm)
    v2 = jnp.max(gl2, axis=-1, keepdims=True)                             # top-2 value
    i2 = jnp.min(jnp.where(gl2 == v2, lane, 128), axis=-1, keepdims=True)
    mask2 = lane == i2

    ex = jnp.exp(glm - m)                                  # masked lanes -> 0
    p = ex * pl.reciprocal(jnp.sum(ex, axis=-1, keepdims=True), approx=True)
    w = jnp.where(mask1 | mask2, p, 0.0)                   # sparse top-2 gate weights

    # ---- expert fc2 on the compact layout: expert e -> lanes [out_dim*e, out_dim*(e+1))
    h = jnp.maximum(z[:, :fc1_real], 0.0).astype(jnp.bfloat16)            # (B, 160)
    eo = jnp.dot(h, wstk_ref[0:fc1_real, :],
                 preferred_element_type=jnp.float32) + b2                 # (B, 128)

    # expand the top-2 gate probs onto the compact output lane groups (masked broadcasts)
    w_exp = jnp.zeros((B, 128), jnp.float32)
    for e in range(E):
        in_grp = (lane >= out_dim * e) & (lane < out_dim * (e + 1))
        w_exp = w_exp + jnp.where(in_grp, w[:, gate_lane + e:gate_lane + e + 1], 0.0)
    acc = eo * w_exp                                       # lanes >= E*out_dim are 0

    # reduce the out_dim-wide expert groups with a circular butterfly on the XLU.
    shift = out_dim
    while shift < 128:
        acc = acc + pltpu.roll(acc, shift, axis=1)
        shift *= 2
    # every out_dim-wide lane group now holds the combined expert output (replicated);
    # classifier rows >= out_dim are zero so the replicas contribute nothing.

    # ---- classifier (bf16 weight, f32 accumulation; lane-dense 128-wide output) ----
    logits = jnp.dot(acc.astype(jnp.bfloat16), wstk_ref[fc1_real:fc1_real + 128, :],
                     preferred_element_type=jnp.float32) + bc
    out_ref[...] = logits.astype(out_ref.dtype)


def pack_params(params, *, input_dim, hidden_dim, output_dim, num_experts, num_classes):
    """Zero-pad / re-lay-out the PyTorch-style parameters into lane-aligned slabs."""
    E, D = num_experts, output_dim
    H = hidden_dim * E                       # 160 real fc1 columns
    assert 128 <= H and H + E <= 256, "gate-fold layout assumes 128 <= H and H+E <= 256"
    assert 128 % D == 0 and (128 // D) & ((128 // D) - 1) == 0
    fused_n = 256                            # fc1 cols [0,H), gate cols [H,H+E), rest 0
    gate_lane = H - 128                      # gate offset inside the 2nd 128-lane slab

    # fused (fc1 | gate) weight: gate folded into the dead fc1 padding lanes.
    wf = jnp.zeros((input_dim, fused_n), jnp.float32)
    wf = wf.at[:, :H].set(params["fc1_w"])
    wf = wf.at[:, H:H + E].set(params["gate_w"])
    bf = jnp.zeros((fused_n,), jnp.float32)
    bf = bf.at[:H].set(params["fc1_b"][0])
    bf = bf.at[H:H + E].set(params["gate_b"][0])

    # compact fc2: all E*D real output columns in a single 128-lane slab.
    w2 = jnp.zeros((H, 128), jnp.float32).at[:, :E * D].set(params["fc2_w"])
    b2 = jnp.zeros((128,), jnp.float32).at[:E * D].set(params["fc2_b"][0])

    # classifier: rows >= D are zero so replicated combine lanes are ignored.
    wc = jnp.zeros((128, 128), jnp.float32).at[:D, :num_classes].set(params["cls_w"])
    bc = jnp.zeros((128,), jnp.float32).at[:num_classes].set(params["cls_b"][0])

    # stack fc2 + classifier weights into one bf16 array (one DMA).
    w_stack = jnp.concatenate([w2, wc], axis=0).astype(jnp.bfloat16)      # (H+128, 128)

    # one packed f32 array for all tiny side vectors (single DMA):
    #   row 0: fused bias | row 1: fc2 bias | row 2: cls bias | row 3: gamma | row 4: beta
    side = jnp.zeros((8, fused_n), jnp.float32)
    side = side.at[0, :].set(bf)
    side = side.at[1, :128].set(b2)
    side = side.at[2, :128].set(bc)
    side = side.at[3, gate_lane:gate_lane + E].set(params["gamma"][0])
    side = side.at[4, gate_lane:gate_lane + E].set(params["beta"][0])

    return {"wf": wf.astype(jnp.bfloat16), "w_stack": w_stack, "side": side,
            "gate_lane": gate_lane, "fc1_real": H}


def moe_grn_forward(x, noise, packed, *, num_experts, num_classes, output_dim, eps=1e-6):
    B = x.shape[0]
    E = num_experts
    gate_lane = packed["gate_lane"]
    fc1_real = packed["fc1_real"]

    x2 = x.reshape(B, -1).astype(jnp.bfloat16)
    noise_p = jnp.zeros((B, 128), jnp.float32).at[:, gate_lane:gate_lane + E].set(noise)

    args = (x2, noise_p, packed["wf"], packed["w_stack"], packed["side"])

    vmem = pl.BlockSpec(memory_space=pltpu.MemorySpace.VMEM)
    kernel = functools.partial(moe_grn_kernel, num_experts=E, gate_lane=gate_lane,
                               out_dim=output_dim, fc1_real=fc1_real, eps=eps)

    flops = 2 * B * (x2.shape[1] * packed["wf"].shape[1] + fc1_real * 128 + 128 * 128)
    bytes_accessed = sum(int(np.prod(a.shape)) * a.dtype.itemsize for a in args) \
        + B * 128 * 4

    logits = pl.pallas_call(
        kernel,
        out_shape=jax.ShapeDtypeStruct((B, 128), jnp.float32),
        in_specs=[vmem] * len(args),
        out_specs=vmem,
        cost_estimate=pl.CostEstimate(flops=flops, transcendentals=B * 128,
                                      bytes_accessed=bytes_accessed),
    )(*args)
    return logits[:, :num_classes]


def moe_grn_reference(x, noise, params, *, num_experts, output_dim, eps=1e-6):
    """Pure-JAX reference mirroring the PyTorch forward, using the same bf16
    quantization of x / weights / intermediate activations as the kernel
    (f32 accumulation everywhere)."""
    B = x.shape[0]
    E, D = num_experts, output_dim
    xf = x.reshape(B, -1).astype(jnp.bfloat16)
    gw = params["gate_w"].astype(jnp.bfloat16)
    f1w = params["fc1_w"].astype(jnp.bfloat16)
    f2w = params["fc2_w"].astype(jnp.bfloat16)
    cw = params["cls_w"].astype(jnp.bfloat16)

    gl = jnp.dot(xf, gw, preferred_element_type=jnp.float32) + params["gate_b"] + noise
    Gx = jnp.linalg.norm(gl, axis=1, keepdims=True)
    Nx = Gx / (jnp.mean(Gx, axis=0, keepdims=True) + eps)
    gl = params["gamma"] * (gl * Nx) + params["beta"]
    p = jax.nn.softmax(gl, axis=-1)
    topk_p, topk_i = jax.lax.top_k(p, 2)

    h = jnp.maximum(jnp.dot(xf, f1w, preferred_element_type=jnp.float32)
                    + params["fc1_b"], 0.0).astype(jnp.bfloat16)
    eo = (jnp.dot(h, f2w, preferred_element_type=jnp.float32)
          + params["fc2_b"]).reshape(B, E, D)
    sel = jnp.take_along_axis(eo, topk_i[:, :, None], axis=1)
    out = jnp.einsum("bk,bkd->bd", topk_p, sel).astype(jnp.bfloat16)
    return jnp.dot(out, cw, preferred_element_type=jnp.float32) + params["cls_b"]


def xavier_uniform(key, shape_in_out):
    fan_in, fan_out = shape_in_out
    bound = float(np.sqrt(6.0 / (fan_in + fan_out)))
    return jax.random.uniform(key, shape_in_out, jnp.float32, -bound, bound)


if __name__ == "__main__":
    # Module hyperparameters (small, consistent with the PyTorch forward).
    B, C, H, W = 2, 4, 16, 16
    input_dim = C * H * W          # 1024
    hidden_dim = 32
    output_dim = 16
    num_experts = 5
    num_classes = 10
    noise_std = 0.1

    root = jax.random.PRNGKey(0)
    keys = jax.random.split(root, 8)

    x = jax.random.normal(keys[0], (B, C, H, W), jnp.float32)
    noise = jax.random.normal(keys[1], (B, num_experts), jnp.float32) * noise_std

    params = {
        "gate_w": xavier_uniform(keys[2], (input_dim, num_experts)),
        "gate_b": jax.random.uniform(keys[3], (1, num_experts), jnp.float32, -0.01, 0.01),
        "fc1_w": xavier_uniform(keys[4], (input_dim, hidden_dim * num_experts)),
        "fc1_b": jnp.zeros((1, hidden_dim * num_experts), jnp.float32),
        "fc2_w": xavier_uniform(keys[5], (hidden_dim * num_experts, output_dim * num_experts)),
        "fc2_b": jnp.zeros((1, output_dim * num_experts), jnp.float32),
        "gamma": jnp.ones((1, num_experts), jnp.float32),
        "beta": jnp.zeros((1, num_experts), jnp.float32),
        "cls_w": xavier_uniform(keys[6], (output_dim, num_classes)),
        "cls_b": jnp.zeros((1, num_classes), jnp.float32),
    }

    packed = pack_params(params, input_dim=input_dim, hidden_dim=hidden_dim,
                         output_dim=output_dim, num_experts=num_experts,
                         num_classes=num_classes)

    out = moe_grn_forward(x, noise, packed, num_experts=num_experts,
                          num_classes=num_classes, output_dim=output_dim)
    out = jax.block_until_ready(out)

    ref = moe_grn_reference(x, noise, params,
                            num_experts=num_experts, output_dim=output_dim)
    ref = jax.block_until_ready(ref)

    assert out.shape == (B, num_classes)
    np.testing.assert_allclose(np.asarray(out), np.asarray(ref), rtol=5e-3, atol=5e-3)
    print("KERNEL_OK")
</pallas_src>

<mosaic_0001>
module attributes {stable_mosaic.version = 11 : i64} {
  func.func @moe_grn_kernel(%arg0: memref<2x1024xbf16, #tpu.memory_space<vmem>>, %arg1: memref<2x128xf32, #tpu.memory_space<vmem>>, %arg2: memref<1024x256xbf16, #tpu.memory_space<vmem>>, %arg3: memref<288x128xbf16, #tpu.memory_space<vmem>>, %arg4: memref<8x256xf32, #tpu.memory_space<vmem>>, %arg5: memref<2x128xf32, #tpu.memory_space<vmem>>) attributes {dimension_semantics = [], scalar_prefetch = 0 : i64, scratch_operands = 0 : i64, tpu.core_type = #tpu.core_type<tc>} {
    %c0 = arith.constant 0 : index
    %c0_0 = arith.constant 0 : index
    %0 = vector.load %arg0[%c0, %c0_0] : memref<2x1024xbf16, #tpu.memory_space<vmem>>, vector<2x1024xbf16>
    %c0_1 = arith.constant 0 : index
    %c0_2 = arith.constant 0 : index
    %1 = vector.load %arg4[%c0_1, %c0_2] : memref<8x256xf32, #tpu.memory_space<vmem>>, vector<8x256xf32>
    %2 = vector.extract_strided_slice %1 {offsets = [0, 0], sizes = [1, 256], strides = [1, 1]} : vector<8x256xf32> to vector<1x256xf32>
    %3 = vector.extract_strided_slice %1 {offsets = [1, 0], sizes = [1, 128], strides = [1, 1]} : vector<8x256xf32> to vector<1x128xf32>
    %4 = vector.extract_strided_slice %1 {offsets = [2, 0], sizes = [1, 128], strides = [1, 1]} : vector<8x256xf32> to vector<1x128xf32>
    %5 = vector.extract_strided_slice %1 {offsets = [3, 0], sizes = [1, 128], strides = [1, 1]} : vector<8x256xf32> to vector<1x128xf32>
    %6 = vector.extract_strided_slice %1 {offsets = [4, 0], sizes = [1, 128], strides = [1, 1]} : vector<8x256xf32> to vector<1x128xf32>
    %c0_3 = arith.constant 0 : index
    %c0_4 = arith.constant 0 : index
    %7 = vector.load %arg2[%c0_3, %c0_4] : memref<1024x256xbf16, #tpu.memory_space<vmem>>, vector<1024x256xbf16>
    %cst = arith.constant dense<0.000000e+00> : vector<2x256xf32>
    %8 = tpu.matmul %0, %7, %cst {dimension_numbers = #tpu.dot_dimension_numbers<[1], [0], [0], [1], [0, 0, 1, 1], [], []>} : vector<2x1024xbf16>, vector<1024x256xbf16>, vector<2x256xf32> -> vector<2x256xf32>
    %9 = vector.broadcast %2 : vector<1x256xf32> to vector<2x256xf32>
    %10 = arith.addf %8, %9 : vector<2x256xf32>
    %11 = vector.extract_strided_slice %10 {offsets = [0, 128], sizes = [2, 128], strides = [1, 1]} : vector<2x256xf32> to vector<2x128xf32>
    %12 = tpu.iota {dimensions = array<i32: 1>} : vector<2x128xi32>
    %c32_i32 = arith.constant 32 : i32
    %13 = vector.broadcast %c32_i32 : i32 to vector<2x128xi32>
    %14 = arith.cmpi sge, %12, %13 : vector<2x128xi32>
    %c37_i32 = arith.constant 37 : i32
    %15 = vector.broadcast %c37_i32 : i32 to vector<2x128xi32>
    %16 = arith.cmpi slt, %12, %15 : vector<2x128xi32>
    %17 = arith.andi %14, %16 : vector<2x128xi1>
    %c0_5 = arith.constant 0 : index
    %c0_6 = arith.constant 0 : index
    %18 = vector.load %arg1[%c0_5, %c0_6] : memref<2x128xf32, #tpu.memory_space<vmem>>, vector<2x128xf32>
    %19 = arith.addf %11, %18 : vector<2x128xf32>
    %cst_7 = arith.constant 0.000000e+00 : f32
    %20 = vector.broadcast %cst_7 : f32 to vector<2x128xf32>
    %21 = arith.select %17, %19, %20 : vector<2x128xi1>, vector<2x128xf32>
    %22 = arith.mulf %21, %21 : vector<2x128xf32>
    %cst_8 = arith.constant dense<0.000000e+00> : vector<2xf32>
    %23 = vector.multi_reduction <add>, %22, %cst_8 [1] : vector<2x128xf32> to vector<2xf32>
    %24 = vector.shape_cast %23 : vector<2xf32> to vector<2x1xf32>
    %25 = math.sqrt %24 : vector<2x1xf32>
    %cst_9 = arith.constant dense<0.000000e+00> : vector<1xf32>
    %26 = vector.multi_reduction <add>, %25, %cst_9 [0] : vector<2x1xf32> to vector<1xf32>
    %27 = vector.shape_cast %26 : vector<1xf32> to vector<1x1xf32>
    %cst_10 = arith.constant 2.000000e+00 : f32
    %28 = vector.broadcast %cst_10 : f32 to vector<1x1xf32>
    %29 = arith.divf %27, %28 : vector<1x1xf32>
    %cst_11 = arith.constant 9.99999997E-7 : f32
    %30 = vector.broadcast %cst_11 : f32 to vector<1x1xf32>
    %31 = arith.addf %29, %30 : vector<1x1xf32>
    %32 = tpu.reciprocal %31 {approx = true} : vector<1x1xf32> -> vector<1x1xf32>
    %33 = vector.broadcast %32 : vector<1x1xf32> to vector<2x1xf32>
    %34 = arith.mulf %25, %33 : vector<2x1xf32>
    %35 = vector.broadcast %34 : vector<2x1xf32> to vector<2x128xf32>
    %36 = arith.mulf %21, %35 : vector<2x128xf32>
    %37 = vector.broadcast %5 : vector<1x128xf32> to vector<2x128xf32>
    %38 = arith.mulf %37, %36 : vector<2x128xf32>
    %39 = vector.broadcast %6 : vector<1x128xf32> to vector<2x128xf32>
    %40 = arith.addf %38, %39 : vector<2x128xf32>
    %cst_12 = arith.constant -1.000000e+30 : f32
    %41 = vector.broadcast %cst_12 : f32 to vector<2x128xf32>
    %42 = arith.select %17, %40, %41 : vector<2x128xi1>, vector<2x128xf32>
    %cst_13 = arith.constant dense<0xFF800000> : vector<2xf32>
    %43 = vector.multi_reduction <maximumf>, %42, %cst_13 [1] : vector<2x128xf32> to vector<2xf32>
    %44 = vector.shape_cast %43 : vector<2xf32> to vector<2x1xf32>
    %45 = vector.broadcast %44 : vector<2x1xf32> to vector<2x128xf32>
    %46 = arith.cmpf oeq, %42, %45 : vector<2x128xf32>
    %c128_i32 = arith.constant 128 : i32
    %47 = vector.broadcast %c128_i32 : i32 to vector<2x128xi32>
    %48 = arith.select %46, %12, %47 : vector<2x128xi1>, vector<2x128xi32>
    %cst_14 = arith.constant dense<2147483647> : vector<2xi32>
    %49 = vector.multi_reduction <minsi>, %48, %cst_14 [1] : vector<2x128xi32> to vector<2xi32>
    %50 = vector.shape_cast %49 : vector<2xi32> to vector<2x1xi32>
    %51 = vector.broadcast %50 : vector<2x1xi32> to vector<2x128xi32>
    %52 = arith.cmpi eq, %12, %51 : vector<2x128xi32>
    %cst_15 = arith.constant -1.000000e+30 : f32
    %53 = vector.broadcast %cst_15 : f32 to vector<2x128xf32>
    %54 = arith.select %52, %53, %42 : vector<2x128xi1>, vector<2x128xf32>
    %cst_16 = arith.constant dense<0xFF800000> : vector<2xf32>
    %55 = vector.multi_reduction <maximumf>, %54, %cst_16 [1] : vector<2x128xf32> to vector<2xf32>
    %56 = vector.shape_cast %55 : vector<2xf32> to vector<2x1xf32>
    %57 = vector.broadcast %56 : vector<2x1xf32> to vector<2x128xf32>
    %58 = arith.cmpf oeq, %54, %57 : vector<2x128xf32>
    %c128_i32_17 = arith.constant 128 : i32
    %59 = vector.broadcast %c128_i32_17 : i32 to vector<2x128xi32>
    %60 = arith.select %58, %12, %59 : vector<2x128xi1>, vector<2x128xi32>
    %cst_18 = arith.constant dense<2147483647> : vector<2xi32>
    %61 = vector.multi_reduction <minsi>, %60, %cst_18 [1] : vector<2x128xi32> to vector<2xi32>
    %62 = vector.shape_cast %61 : vector<2xi32> to vector<2x1xi32>
    %63 = vector.broadcast %62 : vector<2x1xi32> to vector<2x128xi32>
    %64 = arith.cmpi eq, %12, %63 : vector<2x128xi32>
    %65 = vector.broadcast %44 : vector<2x1xf32> to vector<2x128xf32>
    %66 = arith.subf %42, %65 : vector<2x128xf32>
    %67 = math.exp %66 : vector<2x128xf32>
    %cst_19 = arith.constant dense<0.000000e+00> : vector<2xf32>
    %68 = vector.multi_reduction <add>, %67, %cst_19 [1] : vector<2x128xf32> to vector<2xf32>
    %69 = vector.shape_cast %68 : vector<2xf32> to vector<2x1xf32>
    %70 = tpu.reciprocal %69 {approx = true} : vector<2x1xf32> -> vector<2x1xf32>
    %71 = vector.broadcast %70 : vector<2x1xf32> to vector<2x128xf32>
    %72 = arith.mulf %67, %71 : vector<2x128xf32>
    %73 = arith.ori %52, %64 : vector<2x128xi1>
    %cst_20 = arith.constant 0.000000e+00 : f32
    %74 = vector.broadcast %cst_20 : f32 to vector<2x128xf32>
    %75 = arith.select %73, %72, %74 : vector<2x128xi1>, vector<2x128xf32>
    %76 = vector.extract_strided_slice %10 {offsets = [0, 0], sizes = [2, 160], strides = [1, 1]} : vector<2x256xf32> to vector<2x160xf32>
    %cst_21 = arith.constant 0.000000e+00 : f32
    %77 = vector.broadcast %cst_21 : f32 to vector<2x160xf32>
    %78 = arith.maximumf %76, %77 : vector<2x160xf32>
    %79 = arith.truncf %78 : vector<2x160xf32> to vector<2x160xbf16>
    %c0_22 = arith.constant 0 : index
    %c0_23 = arith.constant 0 : index
    %80 = vector.load %arg3[%c0_22, %c0_23] : memref<288x128xbf16, #tpu.memory_space<vmem>>, vector<160x128xbf16>
    %cst_24 = arith.constant dense<0.000000e+00> : vector<2x128xf32>
    %81 = tpu.matmul %79, %80, %cst_24 {dimension_numbers = #tpu.dot_dimension_numbers<[1], [0], [0], [1], [0, 0, 1, 1], [], []>} : vector<2x160xbf16>, vector<160x128xbf16>, vector<2x128xf32> -> vector<2x128xf32>
    %82 = vector.broadcast %3 : vector<1x128xf32> to vector<2x128xf32>
    %83 = arith.addf %81, %82 : vector<2x128xf32>
    %cst_25 = arith.constant 0.000000e+00 : f32
    %84 = vector.broadcast %cst_25 : f32 to vector<2x128xf32>
    %c0_i32 = arith.constant 0 : i32
    %85 = vector.broadcast %c0_i32 : i32 to vector<2x128xi32>
    %86 = arith.cmpi sge, %12, %85 : vector<2x128xi32>
    %c16_i32 = arith.constant 16 : i32
    %87 = vector.broadcast %c16_i32 : i32 to vector<2x128xi32>
    %88 = arith.cmpi slt, %12, %87 : vector<2x128xi32>
    %89 = arith.andi %86, %88 : vector<2x128xi1>
    %90 = vector.extract_strided_slice %75 {offsets = [0, 32], sizes = [2, 1], strides = [1, 1]} : vector<2x128xf32> to vector<2x1xf32>
    %cst_26 = arith.constant 0.000000e+00 : f32
    %91 = vector.shape_cast %90 : vector<2x1xf32> to vector<2x1xf32>
    %92 = vector.broadcast %91 : vector<2x1xf32> to vector<2x128xf32>
    %93 = vector.broadcast %cst_26 : f32 to vector<2x128xf32>
    %94 = arith.select %89, %92, %93 : vector<2x128xi1>, vector<2x128xf32>
    %95 = arith.addf %84, %94 : vector<2x128xf32>
    %c16_i32_27 = arith.constant 16 : i32
    %96 = vector.broadcast %c16_i32_27 : i32 to vector<2x128xi32>
    %97 = arith.cmpi sge, %12, %96 : vector<2x128xi32>
    %c32_i32_28 = arith.constant 32 : i32
    %98 = vector.broadcast %c32_i32_28 : i32 to vector<2x128xi32>
    %99 = arith.cmpi slt, %12, %98 : vector<2x128xi32>
    %100 = arith.andi %97, %99 : vector<2x128xi1>
    %101 = vector.extract_strided_slice %75 {offsets = [0, 33], sizes = [2, 1], strides = [1, 1]} : vector<2x128xf32> to vector<2x1xf32>
    %cst_29 = arith.constant 0.000000e+00 : f32
    %102 = vector.shape_cast %101 : vector<2x1xf32> to vector<2x1xf32>
    %103 = vector.broadcast %102 : vector<2x1xf32> to vector<2x128xf32>
    %104 = vector.broadcast %cst_29 : f32 to vector<2x128xf32>
    %105 = arith.select %100, %103, %104 : vector<2x128xi1>, vector<2x128xf32>
    %106 = arith.addf %95, %105 : vector<2x128xf32>
    %c32_i32_30 = arith.constant 32 : i32
    %107 = vector.broadcast %c32_i32_30 : i32 to vector<2x128xi32>
    %108 = arith.cmpi sge, %12, %107 : vector<2x128xi32>
    %c48_i32 = arith.constant 48 : i32
    %109 = vector.broadcast %c48_i32 : i32 to vector<2x128xi32>
    %110 = arith.cmpi slt, %12, %109 : vector<2x128xi32>
    %111 = arith.andi %108, %110 : vector<2x128xi1>
    %112 = vector.extract_strided_slice %75 {offsets = [0, 34], sizes = [2, 1], strides = [1, 1]} : vector<2x128xf32> to vector<2x1xf32>
    %cst_31 = arith.constant 0.000000e+00 : f32
    %113 = vector.shape_cast %112 : vector<2x1xf32> to vector<2x1xf32>
    %114 = vector.broadcast %113 : vector<2x1xf32> to vector<2x128xf32>
    %115 = vector.broadcast %cst_31 : f32 to vector<2x128xf32>
    %116 = arith.select %111, %114, %115 : vector<2x128xi1>, vector<2x128xf32>
    %117 = arith.addf %106, %116 : vector<2x128xf32>
    %c48_i32_32 = arith.constant 48 : i32
    %118 = vector.broadcast %c48_i32_32 : i32 to vector<2x128xi32>
    %119 = arith.cmpi sge, %12, %118 : vector<2x128xi32>
    %c64_i32 = arith.constant 64 : i32
    %120 = vector.broadcast %c64_i32 : i32 to vector<2x128xi32>
    %121 = arith.cmpi slt, %12, %120 : vector<2x128xi32>
    %122 = arith.andi %119, %121 : vector<2x128xi1>
    %123 = vector.extract_strided_slice %75 {offsets = [0, 35], sizes = [2, 1], strides = [1, 1]} : vector<2x128xf32> to vector<2x1xf32>
    %cst_33 = arith.constant 0.000000e+00 : f32
    %124 = vector.shape_cast %123 : vector<2x1xf32> to vector<2x1xf32>
    %125 = vector.broadcast %124 : vector<2x1xf32> to vector<2x128xf32>
    %126 = vector.broadcast %cst_33 : f32 to vector<2x128xf32>
    %127 = arith.select %122, %125, %126 : vector<2x128xi1>, vector<2x128xf32>
    %128 = arith.addf %117, %127 : vector<2x128xf32>
    %c64_i32_34 = arith.constant 64 : i32
    %129 = vector.broadcast %c64_i32_34 : i32 to vector<2x128xi32>
    %130 = arith.cmpi sge, %12, %129 : vector<2x128xi32>
    %c80_i32 = arith.constant 80 : i32
    %131 = vector.broadcast %c80_i32 : i32 to vector<2x128xi32>
    %132 = arith.cmpi slt, %12, %131 : vector<2x128xi32>
    %133 = arith.andi %130, %132 : vector<2x128xi1>
    %134 = vector.extract_strided_slice %75 {offsets = [0, 36], sizes = [2, 1], strides = [1, 1]} : vector<2x128xf32> to vector<2x1xf32>
    %cst_35 = arith.constant 0.000000e+00 : f32
    %135 = vector.shape_cast %134 : vector<2x1xf32> to vector<2x1xf32>
    %136 = vector.broadcast %135 : vector<2x1xf32> to vector<2x128xf32>
    %137 = vector.broadcast %cst_35 : f32 to vector<2x128xf32>
    %138 = arith.select %133, %136, %137 : vector<2x128xi1>, vector<2x128xf32>
    %139 = arith.addf %128, %138 : vector<2x128xf32>
    %140 = arith.mulf %83, %139 : vector<2x128xf32>
    %c16_i32_36 = arith.constant 16 : i32
    %141 = tpu.dynamic_rotate %140 by %c16_i32_36 dim 1 : vector<2x128xf32>, i32 -> vector<2x128xf32>
    %142 = arith.addf %140, %141 : vector<2x128xf32>
    %c32_i32_37 = arith.constant 32 : i32
    %143 = tpu.dynamic_rotate %142 by %c32_i32_37 dim 1 : vector<2x128xf32>, i32 -> vector<2x128xf32>
    %144 = arith.addf %142, %143 : vector<2x128xf32>
    %c64_i32_38 = arith.constant 64 : i32
    %145 = tpu.dynamic_rotate %144 by %c64_i32_38 dim 1 : vector<2x128xf32>, i32 -> vector<2x128xf32>
    %146 = arith.addf %144, %145 : vector<2x128xf32>
    %147 = arith.truncf %146 : vector<2x128xf32> to vector<2x128xbf16>
    %c160 = arith.constant 160 : index
    %c0_39 = arith.constant 0 : index
    %148 = vector.load %arg3[%c160, %c0_39] : memref<288x128xbf16, #tpu.memory_space<vmem>>, vector<128x128xbf16>
    %cst_40 = arith.constant dense<0.000000e+00> : vector<2x128xf32>
    %149 = tpu.matmul %147, %148, %cst_40 {dimension_numbers = #tpu.dot_dimension_numbers<[1], [0], [0], [1], [0, 0, 1, 1], [], []>} : vector<2x128xbf16>, vector<128x128xbf16>, vector<2x128xf32> -> vector<2x128xf32>
    %150 = vector.broadcast %4 : vector<1x128xf32> to vector<2x128xf32>
    %151 = arith.addf %149, %150 : vector<2x128xf32>
    %c0_41 = arith.constant 0 : index
    %c0_42 = arith.constant 0 : index
    %152 = vector.load %arg5[%c0_41, %c0_42] : memref<2x128xf32, #tpu.memory_space<vmem>>, vector<2x128xf32>
    tpu.vector_store %arg5[%c0_41, %c0_42], %151 {strides = array<i32>} : memref<2x128xf32, #tpu.memory_space<vmem>>, vector<2x128xf32>,
    return
  }
}

</mosaic_0001>

<bundles_post_ra>
// kernel: tpu_custom_call.1
= control target key start
LH: loop header
LB: loop body
LE: loop exit
PB: predicated region body
PF: predicated region fallthrough
CT: control target
= control target key end

     0   :  { %10 = vsyncpa [#allocation3], 0  ;;  %s2249_s0 = inlined_call_operand.hbm [shape: bf16[2,1024], index: 0, kind: input, shape index: {}]   ;;  %s2250_s1 = inlined_call_operand.vmem [shape: f32[2,128], index: 1, kind: input, shape index: {}]   ;;  %s2251_s2 = inlined_call_operand.hbm [shape: bf16[1024,256], index: 2, kind: input, shape index: {}]   ;;  %s2252_s3 = inlined_call_operand.hbm [shape: bf16[288,128], index: 3, kind: input, shape index: {}]   ;;  %s2253_s4 = inlined_call_operand.hbm [shape: f32[8,256], index: 4, kind: input, shape index: {}]   ;;  %s2254_s5 = inlined_call_operand.hbm [shape: f32[2,128], index: 5, kind: output, shape index: {}]  }
   0x1   :  { %11 = vsyncpa [#allocation6], 0 }
   0x2   :  { %12 = vsyncpa [#allocation9], 0 }
   0x3   :  { %13 = vsyncpa [#allocation4], 0  ;;  %s2036_s18 = smov [#allocation5]   ;;  %s1918_s22 = scalar_lea.hbm %s2251_s2, 16384 }
   0x4   :  { %s31_s19 = sshll.u32 %s2036_s18, 4  ;;  %p1919_p0 = scmp.ne.s32.totalorder %s2251_s2, %s1918_s22  ;;  %s32_s19 = int_to_ptr.vmem [resolvable:$true] %s31_s19 }
   0x5   :  { %p1922_p1 = scmp.lt.u32.totalorder %s1918_s22, %s2251_s2 }
   0x7   :  { %p1924_p2 = pnand %p1922_p1, %p1919_p0 }
   0x9   :  { %1927 = shalt.err (!%p1924_p2)
}
   0xa   :  { %s1928_s27 = scalar_lea.vmem %s32_s19, 16384  ;;  %p1933_p4 = scmp.lt.s32.totalorder %s32_s19, %s32_s19 }
   0xb   :  { %p1929_p3 = scmp.ne.s32.totalorder %s32_s19, %s1928_s27  ;;  %p1934_p5 = scmp.lt.s32.totalorder %s1928_s27, %s1928_s27 }
   0xd   :  { %p1935_p6 = por %p1934_p5, %p1933_p4 }
   0xf   :  { %p1936_p7 = pnand %p1935_p6, %p1929_p3 }
  0x11   :  { %1939 = shalt.err (!%p1936_p7)
}
  0x12   :  { %s2037_s28 = smov 128   ;;  %s2038_s29 = smov 8  }
  0x13   :  { %37 = dma.hbm_to_vmem [thread:$0]  %s2251_s2, 16384, %s32_s19, [#allocation6], %s2037_s28, %s2037_s28, %s2038_s29  }
  0x14   :  { %s2039_s7 = smov [#allocation2]   ;;  %s2040_s9 = smov [#allocation7]  }
  0x15   :  { %s20_s8 = sshll.u32 %s2039_s7, 4  ;;  %s43_s10 = sshll.u32 %s2040_s9, 4  ;;  %s21_s8 = int_to_ptr.vmem [resolvable:$true] %s20_s8  ;;  %s44_s10 = int_to_ptr.vmem [resolvable:$true] %s43_s10 }
  0x16   :  { %s1940_s13 = scalar_lea.hbm %s2249_s0, 128 }
  0x17   :  { %p1941_p8 = scmp.ne.s32.totalorder %s2249_s0, %s1940_s13  ;;  %p1944_p9 = scmp.lt.u32.totalorder %s1940_s13, %s2249_s0 }
  0x19   :  { %p1946_p10 = pnand %p1944_p9, %p1941_p8 }
  0x1b   :  { %1949 = shalt.err (!%p1946_p10)
}
  0x1c   :  { %s1950_s2 = scalar_lea.vmem %s21_s8, 128  ;;  %p1955_p12 = scmp.lt.s32.totalorder %s21_s8, %s21_s8 }
  0x1d   :  { %p1951_p11 = scmp.ne.s32.totalorder %s21_s8, %s1950_s2  ;;  %p1956_p13 = scmp.lt.s32.totalorder %s1950_s2, %s1950_s2 }
  0x1f   :  { %p1957_p0 = por %p1956_p13, %p1955_p12 }
  0x21   :  { %p1958_p1 = pnand %p1957_p0, %p1951_p11 }
  0x23   :  { %1961 = shalt.err (!%p1958_p1)
}
  0x24   :  { %23 = dma.hbm_to_vmem [thread:$0]  %s2249_s0, 128, %s21_s8, [#allocation3]  }
  0x25   :  { %s1962_s22 = scalar_lea.hbm %s2252_s3, 2304 }
  0x26   :  { %p1963_p2 = scmp.ne.s32.totalorder %s2252_s3, %s1962_s22  ;;  %p1966_p3 = scmp.lt.u32.totalorder %s1962_s22, %s2252_s3 }
  0x28   :  { %p1968_p4 = pnand %p1966_p3, %p1963_p2 }
  0x2a   :  { %1971 = shalt.err (!%p1968_p4)
}
  0x2b   :  { %s1972_s27 = scalar_lea.vmem %s44_s10, 2304  ;;  %p1977_p6 = scmp.lt.s32.totalorder %s44_s10, %s44_s10 }
  0x2c   :  { %p1973_p5 = scmp.ne.s32.totalorder %s44_s10, %s1972_s27  ;;  %p1978_p7 = scmp.lt.s32.totalorder %s1972_s27, %s1972_s27 }
  0x2e   :  { %p1979_p8 = por %p1978_p7, %p1977_p6 }
  0x30   :  { %p1980_p9 = pnand %p1979_p8, %p1973_p5 }
  0x32   :  { %1983 = shalt.err (!%p1980_p9)
}
  0x33   :  { %s2041_s0 = smov 64   ;;  %s2042_s28 = smov 4  }
  0x34   :  { %49 = dma.hbm_to_vmem [thread:$0]  %s2252_s3, 2304, %s44_s10, [#allocation6], %s2041_s0, %s2041_s0, %s2042_s28  }
  0x35   :  { %s2043_s6 = smov [#allocation8]   ;;  %s1984_s11 = scalar_lea.hbm %s2253_s4, 256 }
  0x36   :  { %s56_s7 = sshll.u32 %s2043_s6, 4  ;;  %p1985_p10 = scmp.ne.s32.totalorder %s2253_s4, %s1984_s11  ;;  %s57_s7 = int_to_ptr.vmem [resolvable:$true] %s56_s7 }
  0x37   :  { %p1988_p11 = scmp.lt.u32.totalorder %s1984_s11, %s2253_s4 }
  0x39   :  { %p1990_p12 = pnand %p1988_p11, %p1985_p10 }
  0x3b   :  { %1993 = shalt.err (!%p1990_p12)
}
  0x3c   :  { %s1994_s16 = scalar_lea.vmem %s57_s7, 256  ;;  %p1999_p0 = scmp.lt.s32.totalorder %s57_s7, %s57_s7 }
  0x3d   :  { %p1995_p13 = scmp.ne.s32.totalorder %s57_s7, %s1994_s16  ;;  %p2000_p1 = scmp.lt.s32.totalorder %s1994_s16, %s1994_s16 }
  0x3f   :  { %p2001_p2 = por %p2000_p1, %p1999_p0 }
  0x41   :  { %p2002_p3 = pnand %p2001_p2, %p1995_p13 }
  0x43   :  { %2005 = shalt.err (!%p2002_p3)
}
  0x44   :  { %59 = dma.hbm_to_vmem [thread:$0]  %s2253_s4, 256, %s57_s7, [#allocation9]  }
  0x45   :  { %2028 = dma.done.wait [#allocation3], 128  }
  0x46   :  { %2029 = vsyncadd [#allocation3], 4294967168 }
  0x47   :  { %2030 = dma.done.wait [#allocation6], 18688  }
  0x48   :  { %2031 = vsyncadd [#allocation6], 4294948608 }
  0x49   :  { %2032 = dma.done.wait [#allocation9], 256  }
  0x4a   :  { %2033 = vsyncadd [#allocation9], 4294967040  ;;  %v1699_v0 = vld [vmem:[#allocation5 + $0x104] ss:$8 sps:$4 sm:$0xff]   ;;  %v1701_v1 = vld [vmem:[#allocation5 + $0x100] ss:$8 sps:$4 sm:$0xff]   ;;  %v204_v7 = vlaneseq }
  0x4b   :  { %951 = vmatprep.subr.bf16.mxu0 %v1699_v0  ;;  %v1702_v2 = vld [vmem:[#allocation5 + $0x114] ss:$8 sps:$4 sm:$0xff]   ;;  %v1704_v3 = vld [vmem:[#allocation5 + $0x110] ss:$8 sps:$4 sm:$0xff]   ;;  %v1705_v4 = vld [vmem:[#allocation5 + $0x124] ss:$8 sps:$4 sm:$0xff]  }
  0x4c   :  { %952 = vmatpush1.bf16.msra.mxu0 %v1701_v1  ;;  %v1707_v5 = vld [vmem:[#allocation5 + $0x120] ss:$8 sps:$4 sm:$0xff]   ;;  %v1708_v6 = vld [vmem:[#allocation5 + $0x134] ss:$8 sps:$4 sm:$0xff]   ;;  %v2044_v8 = vmov 1966171168  }
  0x4d   :  { %953 = vmatprep.subr.bf16.mxu0 %v1702_v2  ;;  %v215_v9 = vunpack.c.l.s4 %v2044_v8  ;;  %v1710_v10 = vld [vmem:[#allocation5 + $0x130] ss:$8 sps:$4 sm:$0xff]   ;;  %v1711_v11 = vld [vmem:[#allocation5 + $0x144] ss:$8 sps:$4 sm:$0xff]   ;;  %v2137_v12 = vshrl.u32 %v204_v7, 7  ;;  %vm1259_vm3 = vcmask 261120  }
  0x4e   :  { %v1713_v14 = vld [vmem:[#allocation5 + $0x140] ss:$8 sps:$4 sm:$0xff]   ;;  %v1714_v15 = vld [vmem:[#allocation5 + $0x154] ss:$8 sps:$4 sm:$0xff]   ;;  %v1716_v17 = vld [vmem:[#allocation5 + $0x150] ss:$8 sps:$4 sm:$0xff]  }
  0x4f   :  { %v216_v13 = vunpack.c.0.s8 %v215_v9  ;;  %v1717_v18 = vld [vmem:[#allocation5 + $0x164] ss:$8 sps:$4 sm:$0xff]   ;;  %v73_v19 = vld [vmem:[#allocation2] sm:$0xff]  ;;  %v1719_v22 = vld [vmem:[#allocation5 + $0x160] ss:$8 sps:$4 sm:$0xff]   ;;  %vm1083_vm4 = vcmask 1041408  }
  0x50   :  { %954 = vmatpush1.bf16.msra.mxu0 %v1704_v3  ;;  %v213_v20 = vcombine.high %v73_v19, %v73_v19  ;;  %v1720_v23 = vld [vmem:[#allocation5 + $0x174] ss:$8 sps:$4 sm:$0xff]   ;;  %v1722_v28 = vld [vmem:[#allocation5 + $0x170] ss:$8 sps:$4 sm:$0xff]   ;;  %v1723_v29 = vld [vmem:[#allocation5 + $0x184] ss:$8 sps:$4 sm:$0xff]  }
  0x51   :  { %955 = vmatprep.subr.bf16.mxu0 %v1705_v4  ;;  %v2140_v16 = vsub.s32 %v216_v13, %v2137_v12  ;;  %v1725_v31 = vld [vmem:[#allocation5 + $0x180] ss:$8 sps:$4 sm:$0xff]   ;;  %v1726_v32 = vld [vmem:[#allocation5 + $0x194] ss:$8 sps:$4 sm:$0xff]   ;;  %v1728_v33 = vld [vmem:[#allocation5 + $0x190] ss:$8 sps:$4 sm:$0xff]  }
  0x52   :  { %v1729_v34 = vld [vmem:[#allocation5 + $0x1a4] ss:$8 sps:$4 sm:$0xff]   ;;  %v1731_v35 = vld [vmem:[#allocation5 + $0x1a0] ss:$8 sps:$4 sm:$0xff]   ;;  %v1732_v36 = vld [vmem:[#allocation5 + $0x1b4] ss:$8 sps:$4 sm:$0xff]  }
  0x53   :  { %v220_v21 = vrot.slane %v73_v19, %v2140_v16  ;;  %v2144_v25 = vrot.slane %v213_v20, %v2140_v16  ;;  %v1793_v37 = vld [vmem:[#allocation5 + $0x4] ss:$8 sps:$4 sm:$0xff]   ;;  %v1795_v38 = vld [vmem:[#allocation5] ss:$8 sps:$4 sm:$0xff]   ;;  %v1734_v39 = vld [vmem:[#allocation5 + $0x1b0] ss:$8 sps:$4 sm:$0xff]  }
  0x54   :  { %956 = vmatpush1.bf16.msra.mxu0 %v1707_v5  ;;  %v1735_v40 = vld [vmem:[#allocation5 + $0x1c4] ss:$8 sps:$4 sm:$0xff]   ;;  %910 = vmatprep.subr.bf16.mxu1 %v1793_v37  ;;  %v1799_v41 = vld [vmem:[#allocation5 + $0x14] ss:$8 sps:$4 sm:$0xff]   ;;  %v1801_v42 = vld [vmem:[#allocation5 + $0x10] ss:$8 sps:$4 sm:$0xff]  }
  0x55   :  { %957 = vmatprep.subr.bf16.mxu0 %v1708_v6  ;;  %v228_v24 = vcombine.high %v220_v21, %v220_v21  ;;  %v2149_v27 = vrot.slane %v2144_v25, %v2140_v16  ;;  %911 = vmatpush1.bf16.msra.mxu1 %v1795_v38  ;;  %v1737_v43 = vld [vmem:[#allocation5 + $0x1c0] ss:$8 sps:$4 sm:$0xff]   ;;  %v1805_v44 = vld [vmem:[#allocation5 + $0x24] ss:$8 sps:$4 sm:$0xff]   ;;  %v1738_v45 = vld [vmem:[#allocation5 + $0x1d4] ss:$8 sps:$4 sm:$0xff]   ;;  %v2152_v55 = vrot.slane %v220_v21, %v2140_v16 }
  0x56   :  { %912 = vmatprep.subr.bf16.mxu1 %v1799_v41  ;;  %v1807_v46 = vld [vmem:[#allocation5 + $0x20] ss:$8 sps:$4 sm:$0xff]   ;;  %v1811_v47 = vld [vmem:[#allocation5 + $0x34] ss:$8 sps:$4 sm:$0xff]   ;;  %v1740_v48 = vld [vmem:[#allocation5 + $0x1d0] ss:$8 sps:$4 sm:$0xff]   ;;  %v229_v58 = vcombine.high %v2144_v25, %v2144_v25 }
  0x57   :  { %v250_v26 = vrot.slane %v228_v24, %v2140_v16  ;;  %v1741_v49 = vld [vmem:[#allocation5 + $0x1e4] ss:$8 sps:$4 sm:$0xff]   ;;  %v1813_v50 = vld [vmem:[#allocation5 + $0x30] ss:$8 sps:$4 sm:$0xff]   ;;  %v1743_v52 = vld [vmem:[#allocation5 + $0x1e0] ss:$8 sps:$4 sm:$0xff]   ;;  %v258_v61 = vcombine.high %v2152_v55, %v2152_v55 }
  0x58   :  { %958 = vmatpush1.bf16.msra.mxu0 %v1710_v10  ;;  %v1817_v51 = vld [vmem:[#allocation5 + $0x44] ss:$8 sps:$4 sm:$0xff]   ;;  %v1744_v53 = vld [vmem:[#allocation5 + $0x1f4] ss:$8 sps:$4 sm:$0xff]   ;;  %v1819_v54 = vld [vmem:[#allocation5 + $0x40] ss:$8 sps:$4 sm:$0xff]   ;;  %v2159_v0 = vrot.slane %v229_v58, %v2140_v16 }
  0x59   :  { %959 = vmatprep.subr.bf16.mxu0 %v1711_v11  ;;  %v260_v30 = vcombine.high %v250_v26, %v250_v26  ;;  %942 = vmatprep.mubr.bf16.mxu1 %v250_v26  ;;  %v1823_v56 = vld [vmem:[#allocation5 + $0x54] ss:$8 sps:$4 sm:$0xff]   ;;  %v1746_v57 = vld [vmem:[#allocation5 + $0x1f0] ss:$8 sps:$4 sm:$0xff]   ;;  %v1750_v59 = vld [vmem:[#allocation5 + $0x204] ss:$8 sps:$4 sm:$0xff]  }
  0x5a   :  { %913 = vmatpush1.bf16.msra.mxu1 %v1801_v42  ;;  %v1825_v60 = vld [vmem:[#allocation5 + $0x50] ss:$8 sps:$4 sm:$0xff]   ;;  %v1829_v62 = vld [vmem:[#allocation5 + $0x64] ss:$8 sps:$4 sm:$0xff]   ;;  %v1748_v63 = vld [vmem:[#allocation5 + $0x200] ss:$8 sps:$4 sm:$0xff]  }
  0x5b   :  { %983 = vmatprep.mubr.bf16.mxu0 %v260_v30  ;;  %914 = vmatprep.subr.bf16.mxu1 %v1805_v44  ;;  %v1753_v1 = vld [vmem:[#allocation5 + $0x214] ss:$8 sps:$4 sm:$0xff]   ;;  %v1831_v2 = vld [vmem:[#allocation5 + $0x60] ss:$8 sps:$4 sm:$0xff]   ;;  %v1751_v4 = vld [vmem:[#allocation5 + $0x210] ss:$8 sps:$4 sm:$0xff]  }
  0x5c   :  { %960 = vmatpush1.bf16.msra.mxu0 %v1713_v14  ;;  %v1835_v3 = vld [vmem:[#allocation5 + $0x74] ss:$8 sps:$4 sm:$0xff]   ;;  %v1756_v5 = vld [vmem:[#allocation5 + $0x224] ss:$8 sps:$4 sm:$0xff]   ;;  %v1837_v6 = vld [vmem:[#allocation5 + $0x70] ss:$8 sps:$4 sm:$0xff]  }
  0x5d   :  { %961 = vmatprep.subr.bf16.mxu0 %v1714_v15  ;;  %v1841_v8 = vld [vmem:[#allocation5 + $0x84] ss:$8 sps:$4 sm:$0xff]   ;;  %v1754_v9 = vld [vmem:[#allocation5 + $0x220] ss:$8 sps:$4 sm:$0xff]   ;;  %v1759_v10 = vld [vmem:[#allocation5 + $0x234] ss:$8 sps:$4 sm:$0xff]  }
  0x5e   :  { %915 = vmatpush1.bf16.msra.mxu1 %v1807_v46  ;;  %v1843_v11 = vld [vmem:[#allocation5 + $0x80] ss:$8 sps:$4 sm:$0xff]   ;;  %v1847_v13 = vld [vmem:[#allocation5 + $0x94] ss:$8 sps:$4 sm:$0xff]   ;;  %v1757_v14 = vld [vmem:[#allocation5 + $0x230] ss:$8 sps:$4 sm:$0xff]  }
  0x5f   :  { %916 = vmatprep.subr.bf16.mxu1 %v1811_v47  ;;  %v1762_v15 = vld [vmem:[#allocation5 + $0x244] ss:$8 sps:$4 sm:$0xff]   ;;  %v1849_v16 = vld [vmem:[#allocation5 + $0x90] ss:$8 sps:$4 sm:$0xff]   ;;  %v1765_v19 = vld [vmem:[#allocation5 + $0x254] ss:$8 sps:$4 sm:$0xff]  }
  0x60   :  { %962 = vmatpush1.bf16.msra.mxu0 %v1716_v17  ;;  %v1853_v17 = vld [vmem:[#allocation5 + $0xa4] ss:$8 sps:$4 sm:$0xff]   ;;  %v1855_v20 = vld [vmem:[#allocation5 + $0xa0] ss:$8 sps:$4 sm:$0xff]   ;;  %v1859_v21 = vld [vmem:[#allocation5 + $0xb4] ss:$8 sps:$4 sm:$0xff]  }
  0x61   :  { %963 = vmatprep.subr.bf16.mxu0 %v1717_v18  ;;  %v1760_v18 = vld [vmem:[#allocation5 + $0x240] ss:$8 sps:$4 sm:$0xff]   ;;  %v1861_v24 = vld [vmem:[#allocation5 + $0xb0] ss:$8 sps:$4 sm:$0xff]   ;;  %v1865_v25 = vld [vmem:[#allocation5 + $0xc4] ss:$8 sps:$4 sm:$0xff]  }
  0x62   :  { %917 = vmatpush1.bf16.msra.mxu1 %v1813_v50  ;;  %v1766_v26 = vld [vmem:[#allocation5 + $0x260] ss:$8 sps:$4 sm:$0xff]   ;;  %v1883_v38 = vld [vmem:[#allocation5 + $0xf4] ss:$8 sps:$4 sm:$0xff]   ;;  %v1885_v41 = vld [vmem:[#allocation5 + $0xf0] ss:$8 sps:$4 sm:$0xff]  }
  0x63   :  { %918 = vmatprep.subr.bf16.mxu1 %v1817_v51  ;;  %v1867_v30 = vld [vmem:[#allocation5 + $0xc0] ss:$8 sps:$4 sm:$0xff]   ;;  %v1781_v46 = vld [vmem:[#allocation5 + $0x2b0] ss:$8 sps:$4 sm:$0xff]   ;;  %v1786_v47 = vld [vmem:[#allocation5 + $0x2c4] ss:$8 sps:$4 sm:$0xff]  }
  0x64   :  { %964 = vmatpush1.bf16.msra.mxu0 %v1719_v22  ;;  %v1763_v22 = vld [vmem:[#allocation5 + $0x250] ss:$8 sps:$4 sm:$0xff]   ;;  %v1879_v37 = vld [vmem:[#allocation5 + $0xe0] ss:$8 sps:$4 sm:$0xff]   ;;  %v1789_v50 = vld [vmem:[#allocation5 + $0x2d4] ss:$8 sps:$4 sm:$0xff]  }
  0x65   :  { %965 = vmatprep.subr.bf16.mxu0 %v1720_v23  ;;  %v1768_v23 = vld [vmem:[#allocation5 + $0x264] ss:$8 sps:$4 sm:$0xff]   ;;  %v1778_v42 = vld [vmem:[#allocation5 + $0x2a0] ss:$8 sps:$4 sm:$0xff]   ;;  %v1894_v51 = vld [vmem:[#allocation7 + $0x10] sm:$0xff]   ;;  %s2053_s2 = smov 32  }
  0x66   :  { %919 = vmatpush1.bf16.msra.mxu1 %v1819_v54  ;;  %v1892_v44 = vld [vmem:[#allocation7] sm:$0xff]   ;;  %v1895_v54 = vld [vmem:[#allocation7 + $0x18] sm:$0xff]   ;;  %s2055_s18 = smov [#allocation10]  }
  0x67   :  { %920 = vmatprep.subr.bf16.mxu1 %v1823_v56  ;;  %v1798_v56 = vld [vmem:[#allocation5 + $0x2f4] ss:$8 sps:$4 sm:$0xff]   ;;  %v1796_v58 = vld [vmem:[#allocation5 + $0x2f0] ss:$8 sps:$4 sm:$0xff]   ;;  %s1474_s19 = sshll.u32 %s2055_s18, 4  ;;  %s1475_s19 = int_to_ptr.vmem [resolvable:$true] %s1474_s19 }
  0x68   :  { %966 = vmatpush1.bf16.msra.mxu0 %v1722_v28  ;;  %v1771_v28 = vld [vmem:[#allocation5 + $0x274] ss:$8 sps:$4 sm:$0xff]   ;;  %s2006_s20 = scalar_lea.vmem %s1475_s19, 32  ;;  %p2011_p5 = scmp.lt.s32.totalorder %s1475_s19, %s1475_s19 }
  0x69   :  { %967 = vmatprep.subr.bf16.mxu0 %v1723_v29  ;;  %v1769_v29 = vld [vmem:[#allocation5 + $0x270] ss:$8 sps:$4 sm:$0xff]   ;;  %p2007_p4 = scmp.ne.s32.totalorder %s1475_s19, %s2006_s20  ;;  %p2012_p6 = scmp.lt.s32.totalorder %s2006_s20, %s2006_s20 }
  0x6a   :  { %921 = vmatpush1.bf16.msra.mxu1 %v1825_v60  ;;  %v1897_v60 = vld [vmem:[#allocation7 + $0x28] sm:$0xff]  }
  0x6b   :  { %922 = vmatprep.subr.bf16.mxu1 %v1829_v62  ;;  %v261_v62 = vcombine.high %v2159_v0, %v2159_v0  ;;  %p2013_p7 = por %p2012_p6, %p2011_p5 }
  0x6c   :  { %968 = vmatpush1.bf16.msra.mxu0 %v1725_v31  ;;  %v1871_v31 = vld [vmem:[#allocation5 + $0xd4] ss:$8 sps:$4 sm:$0xff]  }
  0x6d   :  { %969 = vmatprep.subr.bf16.mxu0 %v1726_v32  ;;  %v1774_v32 = vld [vmem:[#allocation5 + $0x284] ss:$8 sps:$4 sm:$0xff]   ;;  %p2014_p8 = pnand %p2013_p7, %p2007_p4 }
  0x6e   :  { %923 = vmatpush1.bf16.msra.mxu1 %v1831_v2  ;;  %v1808_v2 = vld [vmem:[#allocation5 + $0x310] ss:$8 sps:$4 sm:$0xff]  }
  0x6f   :  { %924 = vmatprep.subr.bf16.mxu1 %v1835_v3  ;;  %v1816_v3 = vld [vmem:[#allocation5 + $0x324] ss:$8 sps:$4 sm:$0xff]  }
  0x70   :  { %970 = vmatpush1.bf16.msra.mxu0 %v1728_v33  ;;  %v1873_v33 = vld [vmem:[#allocation5 + $0xd0] ss:$8 sps:$4 sm:$0xff]  }
  0x71   :  { %971 = vmatprep.subr.bf16.mxu0 %v1729_v34  ;;  %v1877_v34 = vld [vmem:[#allocation5 + $0xe4] ss:$8 sps:$4 sm:$0xff]  }
  0x72   :  { %925 = vmatpush1.bf16.msra.mxu1 %v1837_v6  ;;  %v1828_v6 = vld [vmem:[#allocation5 + $0x344] ss:$8 sps:$4 sm:$0xff]  }
  0x73   :  { %926 = vmatprep.subr.bf16.mxu1 %v1841_v8  ;;  %v1826_v8 = vld [vmem:[#allocation5 + $0x340] ss:$8 sps:$4 sm:$0xff]  }
  0x74   :  { %972 = vmatpush1.bf16.msra.mxu0 %v1731_v35  ;;  %v1772_v35 = vld [vmem:[#allocation5 + $0x280] ss:$8 sps:$4 sm:$0xff]  }
  0x75   :  { %973 = vmatprep.subr.bf16.mxu0 %v1732_v36  ;;  %v1777_v36 = vld [vmem:[#allocation5 + $0x294] ss:$8 sps:$4 sm:$0xff]  }
  0x76   :  { %927 = vmatpush1.bf16.msra.mxu1 %v1843_v11  ;;  %v1840_v11 = vld [vmem:[#allocation5 + $0x364] ss:$8 sps:$4 sm:$0xff]  }
  0x77   :  { %928 = vmatprep.subr.bf16.mxu1 %v1847_v13  ;;  %v1838_v13 = vld [vmem:[#allocation5 + $0x360] ss:$8 sps:$4 sm:$0xff]  }
  0x78   :  { %974 = vmatpush1.bf16.msra.mxu0 %v1734_v39  ;;  %v1775_v39 = vld [vmem:[#allocation5 + $0x290] ss:$8 sps:$4 sm:$0xff]  }
  0x79   :  { %975 = vmatprep.subr.bf16.mxu0 %v1735_v40  ;;  %v1780_v40 = vld [vmem:[#allocation5 + $0x2a4] ss:$8 sps:$4 sm:$0xff]  }
  0x7a   :  { %929 = vmatpush1.bf16.msra.mxu1 %v1849_v16  ;;  %v1852_v16 = vld [vmem:[#allocation5 + $0x384] ss:$8 sps:$4 sm:$0xff]  }
  0x7b   :  { %930 = vmatprep.subr.bf16.mxu1 %v1853_v17  ;;  %v1850_v17 = vld [vmem:[#allocation5 + $0x380] ss:$8 sps:$4 sm:$0xff]  }
  0x7c   :  { %976 = vmatpush1.bf16.msra.mxu0 %v1737_v43  ;;  %v1783_v43 = vld [vmem:[#allocation5 + $0x2b4] ss:$8 sps:$4 sm:$0xff]  }
  0x7d   :  { %977 = vmatprep.subr.bf16.mxu0 %v1738_v45  ;;  %v2045_v45 = vmov 0  }
  0x7e   :  { %931 = vmatpush1.bf16.msra.mxu1 %v1855_v20  ;;  %v1864_v20 = vld [vmem:[#allocation5 + $0x3a4] ss:$8 sps:$4 sm:$0xff]  }
  0x7f   :  { %932 = vmatprep.subr.bf16.mxu1 %v1859_v21  ;;  %v1862_v21 = vld [vmem:[#allocation5 + $0x3a0] ss:$8 sps:$4 sm:$0xff]  }
  0x80   :  { %978 = vmatpush1.bf16.msra.mxu0 %v1740_v48  ;;  %v1893_v48 = vld [vmem:[#allocation7 + $0x8] sm:$0xff]  }
  0x81   :  { %979 = vmatprep.subr.bf16.mxu0 %v1741_v49  ;;  %v1784_v49 = vld [vmem:[#allocation5 + $0x2c0] ss:$8 sps:$4 sm:$0xff]  }
  0x82   :  { %933 = vmatpush1.bf16.msra.mxu1 %v1861_v24  ;;  %v1876_v24 = vld [vmem:[#allocation5 + $0x3c4] ss:$8 sps:$4 sm:$0xff]  }
  0x83   :  { %934 = vmatprep.subr.bf16.mxu1 %v1865_v25  ;;  %v1874_v25 = vld [vmem:[#allocation5 + $0x3c0] ss:$8 sps:$4 sm:$0xff]  }
  0x84   :  { %980 = vmatpush1.bf16.msra.mxu0 %v1743_v52  ;;  %v1787_v52 = vld [vmem:[#allocation5 + $0x2d0] ss:$8 sps:$4 sm:$0xff]  }
  0x85   :  { %981 = vmatprep.subr.bf16.mxu0 %v1744_v53  ;;  %v1792_v53 = vld [vmem:[#allocation5 + $0x2e4] ss:$8 sps:$4 sm:$0xff]  }
  0x86   :  { %935 = vmatpush1.bf16.msra.mxu1 %v1867_v30  ;;  %v1886_v30 = vld [vmem:[#allocation5 + $0x3e0] ss:$8 sps:$4 sm:$0xff]  }
  0x87   :  { %936 = vmatprep.subr.bf16.mxu1 %v1871_v31  ;;  %v1891_v31 = vld [vmem:[#allocation5 + $0x3f4] ss:$8 sps:$4 sm:$0xff]  }
  0x88   :  { %982 = vmatpush1.bf16.msra.mxu0 %v1746_v57  ;;  %v1896_v57 = vld [vmem:[#allocation7 + $0x20] sm:$0xff]  }
  0x89   :  { %992 = vmatprep.subr.bf16.mxu0 %v1750_v59  ;;  %v1804_v59 = vld [vmem:[#allocation5 + $0x304] ss:$8 sps:$4 sm:$0xff]  }
  0x8a   :  { %937 = vmatpush1.bf16.msra.mxu1 %v1873_v33  ;;  %v259_v33 = vcombine.high %v2149_v27, %v2149_v27 }
  0x8b   :  { %984 = vmatmul.mubr.bf16.vlgmr.msra.gmra.mrb[0].mxu0 %v258_v61  ;;  %938 = vmatprep.subr.bf16.mxu1 %v1877_v34  ;;  %v1802_v61 = vld [vmem:[#allocation5 + $0x300] ss:$8 sps:$4 sm:$0xff]   ;;  %v1899_v34 = vld [vmem:[#allocation7 + $0x38] sm:$0xff]  }
  0x8c   :  { %993 = vmatpush1.bf16.msra.mxu0 %v1748_v63  ;;  %1024 = vmatprep.mubr.bf16.mxu0 %v2159_v0  ;;  %v1810_v63 = vld [vmem:[#allocation5 + $0x314] ss:$8 sps:$4 sm:$0xff]  }
  0x8d   :  { %994 = vmatprep.subr.bf16.mxu0 %v1753_v1  ;;  %v1898_v1 = vld [vmem:[#allocation7 + $0x30] sm:$0xff]  }
  0x8e   :  { %939 = vmatpush1.bf16.msra.mxu1 %v1879_v37  ;;  %v1822_v0 = vld [vmem:[#allocation5 + $0x334] ss:$8 sps:$4 sm:$0xff]  }
  0x8f   :  { %940 = vmatprep.subr.bf16.mxu1 %v1883_v38 }
  0x90   :  { %995 = vmatpush1.bf16.msra.mxu0 %v1751_v4  ;;  %v1814_v4 = vld [vmem:[#allocation5 + $0x320] ss:$8 sps:$4 sm:$0xff]  }
  0x91   :  { %996 = vmatprep.subr.bf16.mxu0 %v1756_v5  ;;  %v1820_v5 = vld [vmem:[#allocation5 + $0x330] ss:$8 sps:$4 sm:$0xff]  }
  0x92   :  { %941 = vmatpush1.bf16.msra.mxu1 %v1885_v41  ;;  %v206_v41 = vsub.s32 0, %v2137_v12 }
  0x93   :  { %1263 = vmatprep.subr.bf16.mxu1 %v2045_v45 }
  0x94   :  { %997 = vmatpush1.bf16.msra.mxu0 %v1754_v9  ;;  %v1834_v9 = vld [vmem:[#allocation5 + $0x354] ss:$8 sps:$4 sm:$0xff]  }
  0x95   :  { %998 = vmatprep.subr.bf16.mxu0 %v1759_v10  ;;  %943 = vmatmul.mubr.bf16.vlgmr.msra.gmra.mrb[0].mxu1 %v2152_v55  ;;  %v1790_v55 = vld [vmem:[#allocation5 + $0x2e0] ss:$8 sps:$4 sm:$0xff]   ;;  %v1832_v10 = vld [vmem:[#allocation5 + $0x350] ss:$8 sps:$4 sm:$0xff]  }
  0x96   :  { %1264 = vmatpush1.bf16.msra.mxu1 %v1892_v44 }
  0x97   :  { %1265 = vmatprep.subr.bf16.mxu1 %v2045_v45 }
  0x98   :  { %999 = vmatpush1.bf16.msra.mxu0 %v1757_v14  ;;  %v1846_v14 = vld [vmem:[#allocation5 + $0x374] ss:$8 sps:$4 sm:$0xff]  }
  0x99   :  { %1000 = vmatprep.subr.bf16.mxu0 %v1762_v15  ;;  %v1844_v15 = vld [vmem:[#allocation5 + $0x370] ss:$8 sps:$4 sm:$0xff]  }
  0x9a   :  { %1266 = vmatpush1.bf16.msra.mxu1 %v1893_v48 }
  0x9b   :  { %1267 = vmatprep.subr.bf16.mxu1 %v2045_v45 }
  0x9c   :  { %1001 = vmatpush1.bf16.msra.mxu0 %v1760_v18  ;;  %v1858_v18 = vld [vmem:[#allocation5 + $0x394] ss:$8 sps:$4 sm:$0xff]  }
  0x9d   :  { %1002 = vmatprep.subr.bf16.mxu0 %v1765_v19  ;;  %v1856_v19 = vld [vmem:[#allocation5 + $0x390] ss:$8 sps:$4 sm:$0xff]  }
  0x9e   :  { %1268 = vmatpush1.bf16.msra.mxu1 %v1894_v51  ;;  %v1079_v51 = vld [vmem:[%s2250_s1] sm:$0x3]  ;;  %s2051_s1 = smov 16  }
  0x9f   :  { %1269 = vmatprep.subr.bf16.mxu1 %v2045_v45 }
  0xa0   :  { %1003 = vmatpush1.bf16.msra.mxu0 %v1763_v22  ;;  %v1870_v22 = vld [vmem:[#allocation5 + $0x3b4] ss:$8 sps:$4 sm:$0xff]  }
  0xa1   :  { %1004 = vmatprep.subr.bf16.mxu0 %v1768_v23  ;;  %v1868_v23 = vld [vmem:[#allocation5 + $0x3b0] ss:$8 sps:$4 sm:$0xff]  }
  0xa2   :  { %1270 = vmatpush1.bf16.msra.mxu1 %v1895_v54 }
  0xa3   :  { %1271 = vmatprep.subr.bf16.mxu1 %v2045_v45 }
  0xa4   :  { %1005 = vmatpush1.bf16.msra.mxu0 %v1766_v26  ;;  %v1882_v26 = vld [vmem:[#allocation5 + $0x3d4] ss:$8 sps:$4 sm:$0xff]  }
  0xa5   :  { %1006 = vmatprep.subr.bf16.mxu0 %v1771_v28  ;;  %v1880_v28 = vld [vmem:[#allocation5 + $0x3d0] ss:$8 sps:$4 sm:$0xff]  }
  0xa6   :  { %1272 = vmatpush1.bf16.msra.mxu1 %v1896_v57 }
  0xa7   :  { %1273 = vmatprep.subr.bf16.mxu1 %v2045_v45 }
  0xa8   :  { %1007 = vmatpush1.bf16.msra.mxu0 %v1769_v29  ;;  %v1888_v29 = vld [vmem:[#allocation5 + $0x3e4] ss:$8 sps:$4 sm:$0xff]  }
  0xa9   :  { %1008 = vmatprep.subr.bf16.mxu0 %v1774_v32  ;;  %v1889_v32 = vld [vmem:[#allocation5 + $0x3f0] ss:$8 sps:$4 sm:$0xff]  }
  0xaa   :  { %1274 = vmatpush1.bf16.msra.mxu1 %v1897_v60 }
  0xab   :  { %1275 = vmatprep.subr.bf16.mxu1 %v2045_v45 }
  0xac   :  { %1009 = vmatpush1.bf16.msra.mxu0 %v1772_v35  ;;  %v1900_v35 = vld [vmem:[#allocation7 + $0x40] sm:$0xff]  }
  0xad   :  { %1010 = vmatprep.subr.bf16.mxu0 %v1777_v36  ;;  %v1901_v36 = vld [vmem:[#allocation7 + $0x48] sm:$0xff]  }
  0xae   :  { %1276 = vmatpush1.bf16.msra.mxu1 %v1898_v1 }
  0xaf   :  { %1277 = vmatprep.subr.bf16.mxu1 %v2045_v45 }
  0xb0   :  { %1011 = vmatpush1.bf16.msra.mxu0 %v1775_v39 }
  0xb1   :  { %1012 = vmatprep.subr.bf16.mxu0 %v1780_v40 }
  0xb2   :  { %1278 = vmatpush1.bf16.msra.mxu1 %v1899_v34 }
  0xb3   :  { %1279 = vmatprep.subr.bf16.mxu1 %v2045_v45 }
  0xb4   :  { %1013 = vmatpush1.bf16.msra.mxu0 %v1778_v42  ;;  %v2179_v42 = vld [vmem:[#allocation8] sm:$0xff] }
  0xb5   :  { %1014 = vmatprep.subr.bf16.mxu0 %v1783_v43  ;;  %v207_v43 = vrot.slane %v2179_v42, %v206_v41 }
  0xb6   :  { %1280 = vmatpush1.bf16.msra.mxu1 %v1900_v35 }
  0xb7   :  { %1281 = vmatprep.subr.bf16.mxu1 %v2045_v45 }
  0xb8   :  { %1015 = vmatpush1.bf16.msra.mxu0 %v1781_v46  ;;  %v2183_v46 = vand.u32 127, %v204_v7 }
  0xb9   :  { %1016 = vmatprep.subr.bf16.mxu0 %v1786_v47 }
  0xba   :  { %1282 = vmatpush1.bf16.msra.mxu1 %v1901_v36  ;;  %vm1076_vm0 = vcmp.ge.s32.totalorder %v2183_v46, 32  ;;  %vm1077_vm1 = vcmp.lt.s32.totalorder %v2183_v46, 37  ;;  %vm1313_vm14 = vcmp.ge.s32.totalorder %v2183_v46, 16  ;;  %vm1314_vm15 = vcmp.lt.s32.totalorder %v2183_v46, 32 }
  0xbb   :  { %vm2192_vm2 = vmand %vm1076_vm0, %vm1077_vm1  ;;  %vm1322_vm1 = vcmp.lt.s32.totalorder %v2183_v46, 48 }
  0xbc   :  { %1017 = vmatpush1.bf16.msra.mxu0 %v1784_v49 }
  0xbd   :  { %1018 = vmatprep.subr.bf16.mxu0 %v1789_v50 }
  0xc0   :  { %1019 = vmatpush1.bf16.msra.mxu0 %v1787_v52 }
  0xc1   :  { %1020 = vmatprep.subr.bf16.mxu0 %v1792_v53 }
  0xc4   :  { %1021 = vmatpush1.bf16.msra.mxu0 %v1790_v55 }
  0xc5   :  { %1022 = vmatprep.subr.bf16.mxu0 %v1798_v56 }
  0xc8   :  { %1023 = vmatpush1.bf16.msra.mxu0 %v1796_v58 }
  0xc9   :  { %1033 = vmatprep.subr.bf16.mxu0 %v1804_v59 }
  0xcb   :  { %1025 = vmatmul.mubr.bf16.vlgmr.msra.gmra.mrb[0].mxu0 %v2149_v27  ;;  %v75_v27 = vld [vmem:[#allocation8 + $0x8] sm:$0xff] }
  0xcc   :  { %1034 = vmatpush1.bf16.msra.mxu0 %v1802_v61  ;;  %1065 = vmatprep.mubr.bf16.mxu0 %v261_v62  ;;  %v211_v44 = vrot.slane %v75_v27, %v206_v41 }
  0xcd   :  { %1035 = vmatprep.subr.bf16.mxu0 %v1810_v63 }
  0xd0   :  { %1036 = vmatpush1.bf16.msra.mxu0 %v1808_v2 }
  0xd1   :  { %1037 = vmatprep.subr.bf16.mxu0 %v1816_v3 }
  0xd4   :  { %1038 = vmatpush1.bf16.msra.mxu0 %v1814_v4 }
  0xd5   :  { %1039 = vmatprep.subr.bf16.mxu0 %v1822_v0 }
  0xd8   :  { %1040 = vmatpush1.bf16.msra.mxu0 %v1820_v5 }
  0xd9   :  { %1041 = vmatprep.subr.bf16.mxu0 %v1828_v6 }
  0xdc   :  { %1042 = vmatpush1.bf16.msra.mxu0 %v1826_v8 }
  0xdd   :  { %1043 = vmatprep.subr.bf16.mxu0 %v1834_v9 }
  0xe0   :  { %1044 = vmatpush1.bf16.msra.mxu0 %v1832_v10 }
  0xe1   :  { %1045 = vmatprep.subr.bf16.mxu0 %v1840_v11 }
  0xe4   :  { %1046 = vmatpush1.bf16.msra.mxu0 %v1838_v13 }
  0xe5   :  { %1047 = vmatprep.subr.bf16.mxu0 %v1846_v14 }
  0xe8   :  { %1048 = vmatpush1.bf16.msra.mxu0 %v1844_v15 }
  0xe9   :  { %1049 = vmatprep.subr.bf16.mxu0 %v1852_v16  ;;  %v1109_v16 = vsub.s32 3, %v2137_v12 }
  0xec   :  { %1050 = vmatpush1.bf16.msra.mxu0 %v1850_v17  ;;  %v1114_v17 = vsub.s32 4, %v2137_v12 }
  0xed   :  { %1051 = vmatprep.subr.bf16.mxu0 %v1858_v18 }
  0xf0   :  { %1052 = vmatpush1.bf16.msra.mxu0 %v1856_v19 }
  0xf1   :  { %1053 = vmatprep.subr.bf16.mxu0 %v1864_v20  ;;  %v1110_v20 = vrot.slane %v2179_v42, %v1109_v16 }
  0xf4   :  { %1054 = vmatpush1.bf16.msra.mxu0 %v1862_v21 }
  0xf5   :  { %1055 = vmatprep.subr.bf16.mxu0 %v1870_v22  ;;  %v1115_v22 = vrot.slane %v2179_v42, %v1114_v17 }
  0xf8   :  { %1056 = vmatpush1.bf16.msra.mxu0 %v1868_v23 }
  0xf9   :  { %1057 = vmatprep.subr.bf16.mxu0 %v1876_v24 }
  0xfc   :  { %1058 = vmatpush1.bf16.msra.mxu0 %v1874_v25 }
  0xfd   :  { %1059 = vmatprep.subr.bf16.mxu0 %v1882_v26 }
 0x100   :  { %1060 = vmatpush1.bf16.msra.mxu0 %v1880_v28 }
 0x101   :  { %1061 = vmatprep.subr.bf16.mxu0 %v1888_v29 }
 0x104   :  { %1062 = vmatpush1.bf16.msra.mxu0 %v1886_v30 }
 0x105   :  { %1063 = vmatprep.subr.bf16.mxu0 %v1891_v31 }
 0x108   :  { %1064 = vmatpush1.bf16.msra.mxu0 %v1889_v32 }
 0x10b   :  { %1066 = vmatmul.mubr.bf16.vlgmr.msra.gmra.mrb[0].mxu0 %v259_v33 }
 0x168   :  { %v944_v37 = vpop.f32.mrb[0].mxu1 }
 0x169   :  { %v946_v38 = vpop.f32.mrb[1].mxu1  ;;  %v945_v47 = vadd.f32 %v944_v37, %v207_v43 }
 0x16a   :  { %v948_v39 = vpop.f32.mrb[2].mxu1  ;;  %v947_v48 = vadd.f32 %v946_v38, %v211_v44 }
 0x16b   :  { %v949_v40 = vpop.f32.mrb[3].mxu1 }
 0x1de   :  { %v1067_v45 = vpop.f32.mrb[0].mxu0 }
 0x1df   :  { %v1662_v49 = vadd.f32 %v1067_v45, %v945_v47  ;;  %v1069_v50 = vpop.f32.mrb[1].mxu0 }
 0x1e0   :  { %v1664_v52 = vadd.f32 %v1069_v50, %v947_v48  ;;  %v1071_v53 = vpop.f32.mrb[2].mxu0 }
 0x1e1   :  { %v1171_v54 = vmax.f32 %v1662_v49, 0.0  ;;  %v1072_v55 = vpop.f32.mrb[3].mxu0 }
 0x1e2   :  { %v1080_v56 = vadd.f32 %v1664_v52, %v1079_v51  ;;  %v1172_v57 = vmax.f32 %v1664_v52, 0.0 }
 0x1e3   :  { %v1173_v60 = vpack.c.bf16 %v1171_v54, %v1171_v54 }
 0x1e4   :  { %v1174_v58 = vpack.c.bf16 %v1172_v57, %v1172_v57  ;;  %v1081_v59 = vsel %vm2192_vm2, %v1080_v56, 0.0 }
 0x1e5   :  { %v1082_v61 = vmul.f32 %v1081_v59, %v1081_v59 }
 0x1e6   :  { %1623 = vmatprep.mubr.msk.bf16.mxu1 %vm1259_vm3, %v1174_v58  ;;  %vm1304_vm3 = vcmp.lt.s32.totalorder %v2183_v46, 16 }
 0x1e7   :  { %1296 = vmatmul.mubr.bf16.vlgmr.msra.gmra.mrb[4].mxu1 %v1173_v60  ;;  %v1084_v62 = vsel %vm1083_vm4, %v1082_v61, 0.0  ;;  %v2046_v61 = vmov 33  }
 0x1e8   :  { %1085 = vadd.xlane.f32.xlu0 %v1084_v62  ;;  %1694 = vset.pattern.permute.xlu1 %v2046_v61  ;;  %v2047_v62 = vmov 32  }
 0x1e9   :  { %1693 = vset.pattern.permute.xlu0 %v2047_v62 }
 0x275   :  { %v1086_v63 = vpop.xlane.xlu0 %1085 }
 0x276   :  { %1910 = vrsqrt.f32 %v1086_v63  ;;  %vm1089_vm5 = vcmp.eq.f32.partialorder %v1086_v63, inf  ;;  %v1092_v3 = vand.u32 2147483648, %v1086_v63  ;;  %vm1091_vm6 = vcmp.eq.f32.partialorder %v1086_v63, 0.0 }
 0x280   :  { %v1911_v1 = vpop.eup %1910 }
 0x281   :  { %v1088_v2 = vmul.f32 %v1911_v1, %v1086_v63 }
 0x283   :  { %v1090_v4 = vsel %vm1089_vm5, %v1086_v63, %v1088_v2  ;;  %vm1331_vm5 = vcmp.lt.s32.totalorder %v2183_v46, 64 }
 0x284   :  { %v1093_v0 = vsel %vm1091_vm6, %v1092_v3, %v1090_v4  ;;  %vm1323_vm6 = vmand %vm1076_vm0, %vm1322_vm1  ;;  %vm2054_vm0 = vmmov 0  }
 0x285   :  { %v1094_v5 = vsel %vm1083_vm4, %v1093_v0, 0.0 }
 0x286   :  { %v1095_v6 = vrot.slane %v1094_v5, 4 }
 0x288   :  { %v1096_v8 = vadd.f32 %v1095_v6, %v1094_v5 }
 0x28a   :  { %v1097_v9 = vrot.slane %v1096_v8, 2 }
 0x28c   :  { %v1098_v10 = vadd.f32 %v1097_v9, %v1096_v8  ;;  %v2048_v9 = vmov 34  }
 0x28e   :  { %v1099_v11 = vrot.slane %v1098_v10, 1 }
 0x290   :  { %v1100_v13 = vadd.f32 %v1099_v11, %v1098_v10  ;;  %v2049_v10 = vmov 36   ;;  %v2050_v11 = vmov 35  }
 0x292   :  { %v1102_v14 = vmul.f32 0.5, %v1100_v13 }
 0x294   :  { %v1103_v15 = vadd.f32 1e-06, %v1102_v14 }
 0x296   :  { %1912 = vrcp.f32 %v1103_v15 }
 0x2a0   :  { %v1913_v18 = vpop.eup %1912 }
 0x2a1   :  { %v1105_v19 = vmul.f32 %v1913_v18, %v1093_v0  ;;  %v1197_v18 = vsub.s32 1, %v2137_v12 }
 0x2a3   :  { %v1106_v21 = vmul.f32 %v1105_v19, %v1081_v59 }
 0x2a5   :  { %v1111_v23 = vmul.f32 %v1110_v20, %v1106_v21 }
 0x2a7   :  { %v1116_v24 = vadd.f32 %v1115_v22, %v1111_v23  ;;  %v1198_v23 = vrot.slane %v2179_v42, %v1197_v18 }
 0x2a9   :  { %v1117_v25 = vsel %vm2192_vm2, %v1116_v24, -1e+30  ;;  %vm1315_vm2 = vmand %vm1313_vm14, %vm1314_vm15 }
 0x2aa   :  { %v1118_v26 = vsel %vm1083_vm4, %v1117_v25, -inf }
 0x2ab   :  { %1119 = vmax.xlane.f32.xlu0 %v1118_v26 }
 0x2ba   :  { %v2207_v28 = vpop.f32.mrb[4].mxu1 }
 0x2bb   :  { %v1299_v29 = vpop.f32.mrb[5].mxu1 }
 0x2bc   :  { %v1300_v30 = vpop.f32.mrb[6].mxu1 }
 0x2bd   :  { %v1301_v31 = vpop.f32.mrb[7].mxu1  ;;  %v1298_v30 = vadd.f32 %v2207_v28, %v1198_v23  ;;  %v1906_v28 = vld [vmem:[#allocation7 + $0x70] sm:$0xff]  }
 0x338   :  { %v1120_v32 = vpop.xlane.xlu0 %1119 }
 0x339   :  { %vm1121_vm7 = vcmp.eq.f32.partialorder %v1117_v25, %v1120_v32  ;;  %v1161_v41 = vsub.f32 %v1117_v25, %v1120_v32 }
 0x33a   :  { %v1122_v33 = vsel %vm1121_vm7, %v2183_v46, 128 }
 0x33b   :  { %v1123_v34 = vsel %vm1083_vm4, %v1122_v33, 2147483647  ;;  %v1162_v27 = vmul.f32 1.442695, %v1161_v41  ;;  %v1902_v33 = vld [vmem:[#allocation7 + $0x50] sm:$0xff]   ;;  %v1909_v41 = vld [vmem:[#allocation7 + $0x88] sm:$0xff]  }
 0x33c   :  { %v1125_v35 = vshra.s32 %v1123_v34, 16  ;;  %v1124_v37 = vand.u32 65535, %v1123_v34  ;;  %v2052_v34 = vmov 0.0  }
 0x33d   :  { %1914 = vpow2.f32 %v1162_v27  ;;  %1641 = vmatprep.subr.bf16.mxu1 %v2052_v34  ;;  %1657 = vmatprep.mubr.msk.bf16.mxu1 %vm2054_vm0, %v2052_v34 }
 0x33e   :  { %v1127_v36 = vcvt.s32.f32 %v1125_v35  ;;  %v1126_v39 = vcvt.s32.f32 %v1124_v37  ;;  %1642 = vmatpush3.bf16.msra.mxu1 %v1902_v33  ;;  %v1904_v35 = vld [vmem:[#allocation7 + $0x60] sm:$0xff]  }
 0x33f   :  { %1643 = vmatprep.subr.bf16.mxu1 %v2052_v34 }
 0x340   :  { %1128 = vmin.xlane.f32.xlu1 %v1127_v36 }
 0x347   :  { %v1915_v51 = vpop.eup %1914 }
 0x348   :  { %v1164_v52 = vsel %vm1083_vm4, %v1915_v51, 0.0 }
 0x3cd   :  { %v1129_v38 = vpop.xlane.xlu1 %1128 }
 0x3ce   :  { %vm1130_vm8 = vcmp.eq.f32.partialorder %v1127_v36, %v1129_v38  ;;  %v1135_v43 = vcvt.f32.s32 %v1129_v38  ;;  %v1905_v38 = vld [vmem:[#allocation7 + $0x68] sm:$0xff]  }
 0x3cf   :  { %v1131_v40 = vsel %vm1130_vm8, %v1126_v39, inf  ;;  %vm1339_vm8 = vcmp.ge.s32.totalorder %v2183_v46, 64  ;;  %v1907_v39 = vld [vmem:[#allocation7 + $0x78] sm:$0xff]  }
 0x3d0   :  { %1132 = vmin.xlane.f32.xlu1 %v1131_v40  ;;  %v1136_v47 = vshll.u32 %v1135_v43, 16  ;;  %v1908_v40 = vld [vmem:[#allocation7 + $0x80] sm:$0xff]  }
 0x45d   :  { %v1133_v44 = vpop.xlane.xlu1 %1132 }
 0x45e   :  { %v1134_v48 = vcvt.f32.s32 %v1133_v44 }
 0x460   :  { %v1137_v45 = vadd.s32 %v1136_v47, %v1134_v48 }
 0x462   :  { %vm1138_vm9 = vcmp.eq.s32.totalorder %v2183_v46, %v1137_v45  ;;  %v1377_v45 = vsub.s32 2, %v2137_v12 }
 0x463   :  { %v1139_v49 = vsel %vm1138_vm9, -1e+30, %v1117_v25 }
 0x464   :  { %v1140_v50 = vsel %vm1083_vm4, %v1139_v49, -inf }
 0x465   :  { %1141 = vmax.xlane.f32.xlu0 %v1140_v50 }
 0x469   :  { %1165 = vadd.xlane.f32.xlu0 %v1164_v52 }
 0x4f2   :  { %v1142_v53 = vpop.xlane.xlu0 %1141 }
 0x4f3   :  { %vm1143_vm10 = vcmp.eq.f32.partialorder %v1139_v49, %v1142_v53  ;;  %v1378_v49 = vrot.slane %v2179_v42, %v1377_v45 }
 0x4f4   :  { %v1144_v54 = vsel %vm1143_vm10, %v2183_v46, 128 }
 0x4f5   :  { %v1145_v55 = vsel %vm1083_vm4, %v1144_v54, 2147483647  ;;  %vm1330_vm4 = vcmp.ge.s32.totalorder %v2183_v46, 48 }
 0x4f6   :  { %v1147_v7 = vshra.s32 %v1145_v55, 16  ;;  %v1146_v57 = vand.u32 65535, %v1145_v55  ;;  %v1166_v63 = vpop.xlane.xlu0 %1165  ;;  %vm1332_vm7 = vmand %vm1330_vm4, %vm1331_vm5 }
 0x4f7   :  { %1916 = vrcp.f32 %v1166_v63 }
 0x4f8   :  { %v1149_v56 = vcvt.s32.f32 %v1147_v7  ;;  %v1148_v59 = vcvt.s32.f32 %v1146_v57 }
 0x4fa   :  { %1150 = vmin.xlane.f32.xlu1 %v1149_v56 }
 0x501   :  { %v1917_v0 = vpop.eup %1916 }
 0x502   :  { %v1168_v6 = vmul.f32 %v1917_v0, %v1915_v51 }
 0x587   :  { %v1151_v58 = vpop.xlane.xlu1 %1150 }
 0x588   :  { %vm1152_vm11 = vcmp.eq.f32.partialorder %v1149_v56, %v1151_v58  ;;  %v1157_v1 = vcvt.f32.s32 %v1151_v58 }
 0x589   :  { %v1153_v60 = vsel %vm1152_vm11, %v1148_v59, inf }
 0x58a   :  { %1154 = vmin.xlane.f32.xlu1 %v1153_v60  ;;  %v1158_v3 = vshll.u32 %v1157_v1, 16 }
 0x617   :  { %v1155_v2 = vpop.xlane.xlu1 %1154 }
 0x618   :  { %v1156_v4 = vcvt.f32.s32 %v1155_v2 }
 0x61a   :  { %v1159_v5 = vadd.s32 %v1158_v3, %v1156_v4 }
 0x61c   :  { %vm1160_vm12 = vcmp.eq.s32.totalorder %v2183_v46, %v1159_v5 }
 0x61d   :  { %vm1169_vm13 = vmor %vm1138_vm9, %vm1160_vm12  ;;  %vm1340_vm9 = vcmp.lt.s32.totalorder %v2183_v46, 80  ;;  %v1903_v46 = vld [vmem:[#allocation7 + $0x58] sm:$0xff]  }
 0x61e   :  { %v1170_v8 = vsel %vm1169_vm13, %v1168_v6, 0.0  ;;  %vm1341_vm10 = vmand %vm1339_vm8, %vm1340_vm9  ;;  %1644 = vmatpush3.bf16.msra.mxu1 %v1903_v46 }
 0x61f   :  { %1317 = vperm.xlu1 %1694, %v1170_v8   ;;  %1308 = vperm.xlu0 %1693, %v1170_v8  }
 0x620   :  { %1645 = vmatprep.subr.bf16.mxu1 %v2052_v34 }
 0x622   :  { %1646 = vmatpush3.bf16.msra.mxu1 %v1904_v35 }
 0x623   :  { %1695 = vset.pattern.permute.xlu1 %v2048_v9  ;;  %1698 = vset.pattern.permute.xlu0 %v2049_v10 }
 0x624   :  { %1325 = vperm.xlu1 %1695, %v1170_v8   ;;  %1647 = vmatprep.subr.bf16.mxu1 %v2052_v34 }
 0x626   :  { %1648 = vmatpush3.bf16.msra.mxu1 %v1905_v38 }
 0x627   :  { %1649 = vmatprep.subr.bf16.mxu1 %v2052_v34 }
 0x628   :  { %1696 = vset.pattern.permute.xlu1 %v2050_v11 }
 0x629   :  { %1334 = vperm.xlu1 %1696, %v1170_v8  }
 0x62a   :  { %1650 = vmatpush3.bf16.msra.mxu1 %v1906_v28 }
 0x62b   :  { %1651 = vmatprep.subr.bf16.mxu1 %v2052_v34 }
 0x62d   :  { %1697 = vset.pattern.permute.xlu1 %v2049_v10 }
 0x62e   :  { %1343 = vperm.xlu1 %1697, %v1170_v8   ;;  %1652 = vmatpush3.bf16.msra.mxu1 %v1907_v39 }
 0x62f   :  { %1653 = vmatprep.subr.bf16.mxu1 %v2052_v34 }
 0x632   :  { %1654 = vmatpush3.bf16.msra.mxu1 %v1908_v40 }
 0x633   :  { %1655 = vmatprep.subr.bf16.mxu1 %v2052_v34 }
 0x636   :  { %1656 = vmatpush3.bf16.msra.mxu1 %v1909_v41 }
 0x69e   :  { %v1318_v13 = vpop.permute.xlu1 %1317  ;;  %v1309_v14 = vpop.permute.xlu0 %1308 }
 0x69f   :  { %v1320_v16 = vsel %vm1315_vm2, %v1318_v13, 0.0  ;;  %v1311_v17 = vsel %vm1304_vm3, %v1309_v14, 0.0 }
 0x6a0   :  { %v1321_v21 = vadd.f32 %v1320_v16, %v1311_v17 }
 0x6a3   :  { %v1326_v15 = vpop.permute.xlu1 %1325 }
 0x6a4   :  { %v1328_v19 = vsel %vm1323_vm6, %v1326_v15, 0.0 }
 0x6a5   :  { %v1329_v24 = vadd.f32 %v1328_v19, %v1321_v21 }
 0x6a8   :  { %v1335_v20 = vpop.permute.xlu1 %1334 }
 0x6a9   :  { %v1337_v22 = vsel %vm1332_vm7, %v1335_v20, 0.0 }
 0x6aa   :  { %v1338_v25 = vadd.f32 %v1337_v22, %v1329_v24 }
 0x6ad   :  { %v1344_v26 = vpop.permute.xlu1 %1343 }
 0x6ae   :  { %v1346_v29 = vsel %vm1341_vm10, %v1344_v26, 0.0 }
 0x6af   :  { %v1347_v31 = vadd.f32 %v1346_v29, %v1338_v25 }
 0x6b1   :  { %v1348_v32 = vmul.f32 %v1347_v31, %v1298_v30 }
 0x6b3   :  { %1349 = vrot.lane.b32.xlu1 %v1348_v32, %s2051_s1 }
 0x725   :  { %v1350_v36 = vpop.permute.xlu1 %1349 }
 0x726   :  { %v1351_v37 = vadd.f32 %v1350_v36, %v1348_v32 }
 0x728   :  { %1352 = vrot.lane.b32.xlu1 %v1351_v37, %s2053_s2 }
 0x79a   :  { %v1353_v27 = vpop.permute.xlu1 %1352 }
 0x79b   :  { %v1354_v43 = vadd.f32 %v1353_v27, %v1351_v37 }
 0x79d   :  { %1355 = vrot.lane.b32.xlu1 %v1354_v43, %s2041_s0 }
 0x80f   :  { %v1356_v44 = vpop.permute.xlu1 %1355 }
 0x810   :  { %v1357_v47 = vadd.f32 %v1356_v44, %v1354_v43 }
 0x812   :  { %v1358_v48 = vpack.c.bf16 %v1357_v47, %v1357_v47 }
 0x814   :  { %1658 = vmatmul.mubr.bf16.vlgmr.msra.gmra.mrb[8].mxu1 %v1358_v48 }
 0x8e7   :  { %v1461_v50 = vpop.f32.mrb[8].mxu1 }
 0x8e8   :  { %v1462_v51 = vadd.f32 %v1461_v50, %v1378_v49  ;;  %v1659_v52 = vpop.f32.mrb[9].mxu1 }
 0x8e9   :  { %v1464_v53 = vpop.f32.mrb[10].mxu1 }
 0x8ea   :  { %1467 = vst [vmem:[#allocation10] sm:$0x3] %v1462_v51  ;;  %v1660_v54 = vpop.f32.mrb[11].mxu1 }
 0x8eb   :  { %2017 = shalt.err (!%p2014_p8)
}
 0x8ec   :  { %s2018_s23 = scalar_lea.hbm %s2254_s5, 32 }
 0x8ed   :  { %p2019_p9 = scmp.ne.s32.totalorder %s2254_s5, %s2018_s23  ;;  %p2022_p10 = scmp.lt.u32.totalorder %s2018_s23, %s2254_s5 }
 0x8ef   :  { %p2024_p11 = pnand %p2022_p10, %p2019_p9 }
 0x8f1   :  { %2027 = shalt.err (!%p2024_p11)
}
 0x8f2   :  { %1477 = dma.vmem_to_hbm [thread:$0]  %s1475_s19, 32, %s2254_s5, [#allocation4]  }
 0x8f3   :  { %2034 = dma.done.wait [#allocation4], 32  }
 0x8f4   :  { %2035 = vsyncadd [#allocation4], 4294967264 }
 0x8f5   :  { %1481 = vsyncpa [#allocation3], 1 }
 0x8f6   :  { %1482 = vsyncpa [#allocation6], 1 }
 0x8f7   :  { %1483 = vsyncpa [#allocation9], 1 }
 0x8f8   :  { %1484 = vsyncpa [#allocation4], 1 }

</bundles_post_ra>
